<compile_context>
chip_gen: v6e
topology: v6e:2x2x1
jax: 0.10.0
libtpu: 0.0.40
codegen_flags: <defaults>
</compile_context>

<pallas_src>
import functools

import jax
import jax.numpy as jnp
from jax import lax
from jax.experimental import pallas as pl
from jax.experimental.pallas import tpu as pltpu


def _ffn_kernel(x_ref, p_in_ref, p_out_ref, o_ref, *, B, H, W, C, hf):
    HW = H * W
    N = B * HW
    C2 = 2 * hf

    # ---- fold batch onto the lane axis: (C, B*HW), lane-aligned concat ----
    x = jnp.concatenate([x_ref[b].astype(jnp.float32) for b in range(B)],
                        axis=1)                                    # (C, N)

    # ---- unpack packed params (static lane slices, tiny tiles) ----
    p_in = p_in_ref[...].astype(jnp.float32)                       # (C2, C+11)
    w_in = p_in[:, :C]                                             # (C2, C)
    b_in = p_in[:, C:C + 1]                                        # (C2, 1)
    w_dw = p_in[:, C + 1:C + 10]                                   # (C2, 9)
    b_dw = p_in[:, C + 10:C + 11]                                  # (C2, 1)
    p_out = p_out_ref[...].astype(jnp.float32)                     # (C, hf+1)
    w_out = p_out[:, :hf]                                          # (C, hf)
    b_out = p_out[:, hf:hf + 1]                                    # (C, 1)

    # ---- project_in: 1x1 conv == (C2, C) @ (C, N); N = B*HW on MXU N axis ----
    t = jnp.dot(w_in, x, preferred_element_type=jnp.float32)       # (C2, N)
    t = t + b_in                                                   # lane bcast

    # ---- depthwise 3x3 conv (padding=1): lane rolls + per-image border masks ----
    def _mod(v, m):
        # power-of-two mod -> cheap bit-and, else integer mod
        return (v & (m - 1)) if (m & (m - 1)) == 0 else (v % m)

    pos = lax.broadcasted_iota(jnp.int32, (1, N), 1)     # folded flat index
    pos_img = _mod(pos, HW)                              # index within image
    col = _mod(pos, W)
    not_top = pos_img >= W
    not_bot = pos_img < HW - W
    not_left = col >= 1
    not_right = col <= W - 2
    row_m = (not_top, None, not_bot)                     # di = 0, 1, 2
    col_m = (not_left, None, not_right)                  # dj = 0, 1, 2

    def _and(a, b):
        if a is None:
            return b
        if b is None:
            return a
        return a & b

    # Hoist all 8 mask combinations and the 9 weight-column extracts above
    # the tap loop.
    mask_grid = [[_and(row_m[di], col_m[dj]) for dj in range(3)]
                 for di in range(3)]
    w_cols = [w_dw[:, k:k + 1] for k in range(9)]

    # Three independent partial accumulators (one per kernel row); seed the
    # first with the broadcast dw-bias instead of zeros.
    accs = [jnp.broadcast_to(b_dw, (C2, N)), None, None]
    for di in range(3):
        for dj in range(3):
            off = (di - 1) * W + (dj - 1)
            tap = t if off == 0 else pltpu.roll(t, shift=(-off) % N, axis=1)
            m = mask_grid[di][dj]
            if m is not None:
                tap = jnp.where(m, tap, 0.0)
            contrib = w_cols[di * 3 + dj] * tap                    # lane bcast
            accs[di] = contrib if accs[di] is None else accs[di] + contrib
    acc = (accs[0] + accs[1]) + accs[2]                            # (C2, N)

    # ---- gating: channel chunk == free sublane split; exact (erf) gelu ----
    x1 = acc[:hf]                                                  # (hf, N)
    x2 = acc[hf:]                                                  # (hf, N)
    inv_sqrt2 = jnp.float32(0.7071067811865476)
    g = 0.5 * x1 * (1.0 + lax.erf(x1 * inv_sqrt2))
    y = g * x2                                                     # (hf, N)

    # ---- project_out: 1x1 conv == (C, hf) @ (hf, N) ----
    out = jnp.dot(w_out, y, preferred_element_type=jnp.float32) + b_out

    # ---- unfold batch: static, 256-lane-aligned slices ----
    for b in range(B):
        o_ref[b] = out[:, b * HW:(b + 1) * HW].astype(o_ref.dtype)


@jax.jit
def feedforward_pallas(x_nchw, w_in, b_in, w_dw, b_dw, w_out, b_out):
    """x_nchw: (B, dim, H, W); weights in PyTorch conv layouts (OIHW / O,1,3,3)."""
    B, C, H, W = x_nchw.shape
    HW = H * W
    C2 = w_in.shape[0]               # 2 * hidden_features
    hf = C2 // 2

    # NCHW -> (B, C, H*W): contiguous metadata reshape, no HBM transpose.
    x = x_nchw.reshape(B, C, HW)

    # Pack per-output-channel params into two tensors (fewer tiny DMAs):
    #   p_in  = [w_in | b_in | w_dw (9 taps, row-major) | b_dw]  -> (C2, C+11)
    #   p_out = [w_out | b_out]                                  -> (C,  hf+1)
    p_in = jnp.concatenate(
        [w_in[:, :, 0, 0], b_in[:, None],
         w_dw[:, 0, :, :].reshape(C2, 9), b_dw[:, None]], axis=1)
    p_out = jnp.concatenate([w_out[:, :, 0, 0], b_out[:, None]], axis=1)

    kernel = functools.partial(_ffn_kernel, B=B, H=H, W=W, C=C, hf=hf)

    grid_spec = pltpu.PrefetchScalarGridSpec(
        num_scalar_prefetch=0,
        grid=(1,),                               # single step: batch folded
        in_specs=[
            pl.BlockSpec((B, C, HW), lambda i: (0, 0, 0)),
            pl.BlockSpec((C2, C + 11), lambda i: (0, 0)),
            pl.BlockSpec((C, hf + 1), lambda i: (0, 0)),
        ],
        out_specs=pl.BlockSpec((B, C, HW), lambda i: (0, 0, 0)),
    )

    flops = B * HW * (2 * C2 * C + 18 * C2 + 8 * hf + 2 * C * hf)
    bytes_accessed = 4 * (2 * B * C * HW + C2 * (C + 11) + C * (hf + 1))
    cost = pl.CostEstimate(flops=flops,
                           transcendentals=B * hf * HW,
                           bytes_accessed=bytes_accessed)

    out = pl.pallas_call(
        kernel,
        out_shape=jax.ShapeDtypeStruct((B, C, HW), x_nchw.dtype),
        grid_spec=grid_spec,
        compiler_params=pltpu.CompilerParams(
            dimension_semantics=("arbitrary",)),
        cost_estimate=cost,
    )(x, p_in, p_out)

    # (B, C, H*W) -> NCHW, metadata reshape only.
    return out.reshape(B, C, H, W)


def feedforward_reference(x_nchw, w_in, b_in, w_dw, b_dw, w_out, b_out):
    """Plain-JAX reference mirroring the PyTorch module (NCHW)."""
    hidden2 = w_in.shape[0]
    y = lax.conv_general_dilated(
        x_nchw, w_in, (1, 1), 'VALID',
        dimension_numbers=('NCHW', 'OIHW', 'NCHW')) + b_in[None, :, None, None]
    y = lax.conv_general_dilated(
        y, w_dw, (1, 1), ((1, 1), (1, 1)),
        dimension_numbers=('NCHW', 'OIHW', 'NCHW'),
        feature_group_count=hidden2) + b_dw[None, :, None, None]
    x1, x2 = jnp.split(y, 2, axis=1)
    g = jax.nn.gelu(x1, approximate=False) * x2
    out = lax.conv_general_dilated(
        g, w_out, (1, 1), 'VALID',
        dimension_numbers=('NCHW', 'OIHW', 'NCHW')) + b_out[None, :, None, None]
    return out


if __name__ == "__main__":
    # Module config: FeedForward(dim=4, ffn_expansion_factor=2, bias=True)
    dim = 4
    ffn_expansion_factor = 2
    hidden = int(dim * ffn_expansion_factor)      # 8
    hidden2 = hidden * 2                          # 16
    B, H, W = 2, 16, 16

    key = jax.random.PRNGKey(0)
    ks = jax.random.split(key, 7)
    x = jax.random.normal(ks[0], (B, dim, H, W), jnp.float32)

    # Deterministic synthetic parameters (PyTorch conv layouts).
    w_in = jax.random.normal(ks[1], (hidden2, dim, 1, 1), jnp.float32) * 0.2
    b_in = jax.random.normal(ks[2], (hidden2,), jnp.float32) * 0.1
    w_dw = jax.random.normal(ks[3], (hidden2, 1, 3, 3), jnp.float32) * 0.2
    b_dw = jax.random.normal(ks[4], (hidden2,), jnp.float32) * 0.1
    w_out = jax.random.normal(ks[5], (dim, hidden, 1, 1), jnp.float32) * 0.2
    b_out = jax.random.normal(ks[6], (dim,), jnp.float32) * 0.1

    out = feedforward_pallas(x, w_in, b_in, w_dw, b_dw, w_out, b_out)
    out = jax.block_until_ready(out)

    ref = feedforward_reference(x, w_in, b_in, w_dw, b_dw, w_out, b_out)
    ref = jax.block_until_ready(ref)

    assert out.shape == (B, dim, H, W), out.shape
    assert jnp.allclose(out, ref, atol=1e-3, rtol=1e-3), (
        float(jnp.max(jnp.abs(out - ref))))

    print("KERNEL_OK")
</pallas_src>

<mosaic_0001>
module attributes {stable_mosaic.version = 11 : i64} {
  func.func @_ffn_kernel(%arg0: i32, %arg1: memref<2x4x256xf32, #tpu.memory_space<vmem>>, %arg2: memref<16x15xf32, #tpu.memory_space<vmem>>, %arg3: memref<4x9xf32, #tpu.memory_space<vmem>>, %arg4: memref<2x4x256xf32, #tpu.memory_space<vmem>>) attributes {dimension_semantics = [#tpu.dimension_semantics<arbitrary>], iteration_bounds = array<i64: 1>, scalar_prefetch = 0 : i64, scratch_operands = 0 : i64, tpu.core_type = #tpu.core_type<tc>, window_params = [{pipeline_mode = #tpu.pipeline_mode<synchronous>, transform_indices = @transform_0, window_bounds = array<i64: 2, 4, 256>}, {pipeline_mode = #tpu.pipeline_mode<synchronous>, transform_indices = @transform_1, window_bounds = array<i64: 16, 15>}, {pipeline_mode = #tpu.pipeline_mode<synchronous>, transform_indices = @transform_2, window_bounds = array<i64: 4, 9>}, {pipeline_mode = #tpu.pipeline_mode<synchronous>, transform_indices = @transform_3, window_bounds = array<i64: 2, 4, 256>}]} {
    %c0 = arith.constant 0 : index
    %c0_0 = arith.constant 0 : index
    %c0_1 = arith.constant 0 : index
    %0 = vector.load %arg1[%c0, %c0_0, %c0_1] : memref<2x4x256xf32, #tpu.memory_space<vmem>>, vector<1x4x256xf32>
    %1 = vector.shape_cast %0 : vector<1x4x256xf32> to vector<4x256xf32>
    %c1 = arith.constant 1 : index
    %c0_2 = arith.constant 0 : index
    %c0_3 = arith.constant 0 : index
    %2 = vector.load %arg1[%c1, %c0_2, %c0_3] : memref<2x4x256xf32, #tpu.memory_space<vmem>>, vector<1x4x256xf32>
    %3 = vector.shape_cast %2 : vector<1x4x256xf32> to vector<4x256xf32>
    %4 = tpu.concatenate %1, %3 in 1 : vector<4x256xf32>, vector<4x256xf32> -> vector<4x512xf32>
    %c0_4 = arith.constant 0 : index
    %c0_5 = arith.constant 0 : index
    %5 = vector.load %arg2[%c0_4, %c0_5] : memref<16x15xf32, #tpu.memory_space<vmem>>, vector<16x15xf32>
    %6 = vector.extract_strided_slice %5 {offsets = [0, 0], sizes = [16, 4], strides = [1, 1]} : vector<16x15xf32> to vector<16x4xf32>
    %7 = vector.extract_strided_slice %5 {offsets = [0, 4], sizes = [16, 1], strides = [1, 1]} : vector<16x15xf32> to vector<16x1xf32>
    %8 = vector.extract_strided_slice %5 {offsets = [0, 5], sizes = [16, 9], strides = [1, 1]} : vector<16x15xf32> to vector<16x9xf32>
    %9 = vector.extract_strided_slice %5 {offsets = [0, 14], sizes = [16, 1], strides = [1, 1]} : vector<16x15xf32> to vector<16x1xf32>
    %c0_6 = arith.constant 0 : index
    %c0_7 = arith.constant 0 : index
    %10 = vector.load %arg3[%c0_6, %c0_7] : memref<4x9xf32, #tpu.memory_space<vmem>>, vector<4x9xf32>
    %11 = vector.extract_strided_slice %10 {offsets = [0, 0], sizes = [4, 8], strides = [1, 1]} : vector<4x9xf32> to vector<4x8xf32>
    %12 = vector.extract_strided_slice %10 {offsets = [0, 8], sizes = [4, 1], strides = [1, 1]} : vector<4x9xf32> to vector<4x1xf32>
    %cst = arith.constant dense<0.000000e+00> : vector<16x512xf32>
    %13 = tpu.matmul %6, %4, %cst {dimension_numbers = #tpu.dot_dimension_numbers<[1], [0], [0], [1], [0, 0, 1, 1], [], []>} : vector<16x4xf32>, vector<4x512xf32>, vector<16x512xf32> -> vector<16x512xf32>
    %14 = vector.broadcast %7 : vector<16x1xf32> to vector<16x512xf32>
    %15 = arith.addf %13, %14 : vector<16x512xf32>
    %16 = tpu.iota {dimensions = array<i32: 1>} : vector<1x512xi32>
    %c255_i32 = arith.constant 255 : i32
    %17 = vector.broadcast %c255_i32 : i32 to vector<1x512xi32>
    %18 = arith.andi %16, %17 : vector<1x512xi32>
    %c15_i32 = arith.constant 15 : i32
    %19 = vector.broadcast %c15_i32 : i32 to vector<1x512xi32>
    %20 = arith.andi %16, %19 : vector<1x512xi32>
    %c16_i32 = arith.constant 16 : i32
    %21 = vector.broadcast %c16_i32 : i32 to vector<1x512xi32>
    %22 = arith.cmpi sge, %18, %21 : vector<1x512xi32>
    %c240_i32 = arith.constant 240 : i32
    %23 = vector.broadcast %c240_i32 : i32 to vector<1x512xi32>
    %24 = arith.cmpi slt, %18, %23 : vector<1x512xi32>
    %c1_i32 = arith.constant 1 : i32
    %25 = vector.broadcast %c1_i32 : i32 to vector<1x512xi32>
    %26 = arith.cmpi sge, %20, %25 : vector<1x512xi32>
    %c14_i32 = arith.constant 14 : i32
    %27 = vector.broadcast %c14_i32 : i32 to vector<1x512xi32>
    %28 = arith.cmpi sle, %20, %27 : vector<1x512xi32>
    %29 = arith.andi %22, %26 : vector<1x512xi1>
    %30 = arith.andi %22, %28 : vector<1x512xi1>
    %31 = arith.andi %24, %26 : vector<1x512xi1>
    %32 = arith.andi %24, %28 : vector<1x512xi1>
    %33 = vector.extract_strided_slice %8 {offsets = [0, 0], sizes = [16, 1], strides = [1, 1]} : vector<16x9xf32> to vector<16x1xf32>
    %34 = vector.extract_strided_slice %8 {offsets = [0, 1], sizes = [16, 1], strides = [1, 1]} : vector<16x9xf32> to vector<16x1xf32>
    %35 = vector.extract_strided_slice %8 {offsets = [0, 2], sizes = [16, 1], strides = [1, 1]} : vector<16x9xf32> to vector<16x1xf32>
    %36 = vector.extract_strided_slice %8 {offsets = [0, 3], sizes = [16, 1], strides = [1, 1]} : vector<16x9xf32> to vector<16x1xf32>
    %37 = vector.extract_strided_slice %8 {offsets = [0, 4], sizes = [16, 1], strides = [1, 1]} : vector<16x9xf32> to vector<16x1xf32>
    %38 = vector.extract_strided_slice %8 {offsets = [0, 5], sizes = [16, 1], strides = [1, 1]} : vector<16x9xf32> to vector<16x1xf32>
    %39 = vector.extract_strided_slice %8 {offsets = [0, 6], sizes = [16, 1], strides = [1, 1]} : vector<16x9xf32> to vector<16x1xf32>
    %40 = vector.extract_strided_slice %8 {offsets = [0, 7], sizes = [16, 1], strides = [1, 1]} : vector<16x9xf32> to vector<16x1xf32>
    %41 = vector.extract_strided_slice %8 {offsets = [0, 8], sizes = [16, 1], strides = [1, 1]} : vector<16x9xf32> to vector<16x1xf32>
    %42 = vector.shape_cast %9 : vector<16x1xf32> to vector<16x1xf32>
    %43 = vector.broadcast %42 : vector<16x1xf32> to vector<16x512xf32>
    %c17_i32 = arith.constant 17 : i32
    %44 = tpu.dynamic_rotate %15 by %c17_i32 dim 1 : vector<16x512xf32>, i32 -> vector<16x512xf32>
    %cst_8 = arith.constant 0.000000e+00 : f32
    %45 = vector.shape_cast %29 : vector<1x512xi1> to vector<1x512xi1>
    %46 = vector.broadcast %45 : vector<1x512xi1> to vector<16x512xi1>
    %47 = vector.broadcast %cst_8 : f32 to vector<16x512xf32>
    %48 = arith.select %46, %44, %47 : vector<16x512xi1>, vector<16x512xf32>
    %49 = vector.broadcast %33 : vector<16x1xf32> to vector<16x512xf32>
    %50 = arith.mulf %49, %48 : vector<16x512xf32>
    %51 = arith.addf %43, %50 : vector<16x512xf32>
    %c16_i32_9 = arith.constant 16 : i32
    %52 = tpu.dynamic_rotate %15 by %c16_i32_9 dim 1 : vector<16x512xf32>, i32 -> vector<16x512xf32>
    %cst_10 = arith.constant 0.000000e+00 : f32
    %53 = vector.shape_cast %22 : vector<1x512xi1> to vector<1x512xi1>
    %54 = vector.broadcast %53 : vector<1x512xi1> to vector<16x512xi1>
    %55 = vector.broadcast %cst_10 : f32 to vector<16x512xf32>
    %56 = arith.select %54, %52, %55 : vector<16x512xi1>, vector<16x512xf32>
    %57 = vector.broadcast %34 : vector<16x1xf32> to vector<16x512xf32>
    %58 = arith.mulf %57, %56 : vector<16x512xf32>
    %59 = arith.addf %51, %58 : vector<16x512xf32>
    %c15_i32_11 = arith.constant 15 : i32
    %60 = tpu.dynamic_rotate %15 by %c15_i32_11 dim 1 : vector<16x512xf32>, i32 -> vector<16x512xf32>
    %cst_12 = arith.constant 0.000000e+00 : f32
    %61 = vector.shape_cast %30 : vector<1x512xi1> to vector<1x512xi1>
    %62 = vector.broadcast %61 : vector<1x512xi1> to vector<16x512xi1>
    %63 = vector.broadcast %cst_12 : f32 to vector<16x512xf32>
    %64 = arith.select %62, %60, %63 : vector<16x512xi1>, vector<16x512xf32>
    %65 = vector.broadcast %35 : vector<16x1xf32> to vector<16x512xf32>
    %66 = arith.mulf %65, %64 : vector<16x512xf32>
    %67 = arith.addf %59, %66 : vector<16x512xf32>
    %c1_i32_13 = arith.constant 1 : i32
    %68 = tpu.dynamic_rotate %15 by %c1_i32_13 dim 1 : vector<16x512xf32>, i32 -> vector<16x512xf32>
    %cst_14 = arith.constant 0.000000e+00 : f32
    %69 = vector.shape_cast %26 : vector<1x512xi1> to vector<1x512xi1>
    %70 = vector.broadcast %69 : vector<1x512xi1> to vector<16x512xi1>
    %71 = vector.broadcast %cst_14 : f32 to vector<16x512xf32>
    %72 = arith.select %70, %68, %71 : vector<16x512xi1>, vector<16x512xf32>
    %73 = vector.broadcast %36 : vector<16x1xf32> to vector<16x512xf32>
    %74 = arith.mulf %73, %72 : vector<16x512xf32>
    %75 = vector.broadcast %37 : vector<16x1xf32> to vector<16x512xf32>
    %76 = arith.mulf %75, %15 : vector<16x512xf32>
    %77 = arith.addf %74, %76 : vector<16x512xf32>
    %c511_i32 = arith.constant 511 : i32
    %78 = tpu.dynamic_rotate %15 by %c511_i32 dim 1 : vector<16x512xf32>, i32 -> vector<16x512xf32>
    %cst_15 = arith.constant 0.000000e+00 : f32
    %79 = vector.shape_cast %28 : vector<1x512xi1> to vector<1x512xi1>
    %80 = vector.broadcast %79 : vector<1x512xi1> to vector<16x512xi1>
    %81 = vector.broadcast %cst_15 : f32 to vector<16x512xf32>
    %82 = arith.select %80, %78, %81 : vector<16x512xi1>, vector<16x512xf32>
    %83 = vector.broadcast %38 : vector<16x1xf32> to vector<16x512xf32>
    %84 = arith.mulf %83, %82 : vector<16x512xf32>
    %85 = arith.addf %77, %84 : vector<16x512xf32>
    %c497_i32 = arith.constant 497 : i32
    %86 = tpu.dynamic_rotate %15 by %c497_i32 dim 1 : vector<16x512xf32>, i32 -> vector<16x512xf32>
    %cst_16 = arith.constant 0.000000e+00 : f32
    %87 = vector.shape_cast %31 : vector<1x512xi1> to vector<1x512xi1>
    %88 = vector.broadcast %87 : vector<1x512xi1> to vector<16x512xi1>
    %89 = vector.broadcast %cst_16 : f32 to vector<16x512xf32>
    %90 = arith.select %88, %86, %89 : vector<16x512xi1>, vector<16x512xf32>
    %91 = vector.broadcast %39 : vector<16x1xf32> to vector<16x512xf32>
    %92 = arith.mulf %91, %90 : vector<16x512xf32>
    %c496_i32 = arith.constant 496 : i32
    %93 = tpu.dynamic_rotate %15 by %c496_i32 dim 1 : vector<16x512xf32>, i32 -> vector<16x512xf32>
    %cst_17 = arith.constant 0.000000e+00 : f32
    %94 = vector.shape_cast %24 : vector<1x512xi1> to vector<1x512xi1>
    %95 = vector.broadcast %94 : vector<1x512xi1> to vector<16x512xi1>
    %96 = vector.broadcast %cst_17 : f32 to vector<16x512xf32>
    %97 = arith.select %95, %93, %96 : vector<16x512xi1>, vector<16x512xf32>
    %98 = vector.broadcast %40 : vector<16x1xf32> to vector<16x512xf32>
    %99 = arith.mulf %98, %97 : vector<16x512xf32>
    %100 = arith.addf %92, %99 : vector<16x512xf32>
    %c495_i32 = arith.constant 495 : i32
    %101 = tpu.dynamic_rotate %15 by %c495_i32 dim 1 : vector<16x512xf32>, i32 -> vector<16x512xf32>
    %cst_18 = arith.constant 0.000000e+00 : f32
    %102 = vector.shape_cast %32 : vector<1x512xi1> to vector<1x512xi1>
    %103 = vector.broadcast %102 : vector<1x512xi1> to vector<16x512xi1>
    %104 = vector.broadcast %cst_18 : f32 to vector<16x512xf32>
    %105 = arith.select %103, %101, %104 : vector<16x512xi1>, vector<16x512xf32>
    %106 = vector.broadcast %41 : vector<16x1xf32> to vector<16x512xf32>
    %107 = arith.mulf %106, %105 : vector<16x512xf32>
    %108 = arith.addf %100, %107 : vector<16x512xf32>
    %109 = arith.addf %67, %85 : vector<16x512xf32>
    %110 = arith.addf %109, %108 : vector<16x512xf32>
    %111 = vector.extract_strided_slice %110 {offsets = [0, 0], sizes = [8, 512], strides = [1, 1]} : vector<16x512xf32> to vector<8x512xf32>
    %112 = vector.extract_strided_slice %110 {offsets = [8, 0], sizes = [8, 512], strides = [1, 1]} : vector<16x512xf32> to vector<8x512xf32>
    %cst_19 = arith.constant 5.000000e-01 : f32
    %113 = vector.broadcast %cst_19 : f32 to vector<8x512xf32>
    %114 = arith.mulf %113, %111 : vector<8x512xf32>
    %cst_20 = arith.constant 0.707106769 : f32
    %115 = vector.broadcast %cst_20 : f32 to vector<8x512xf32>
    %116 = arith.mulf %111, %115 : vector<8x512xf32>
    %117 = math.erf %116 : vector<8x512xf32>
    %cst_21 = arith.constant 1.000000e+00 : f32
    %118 = vector.broadcast %cst_21 : f32 to vector<8x512xf32>
    %119 = arith.addf %118, %117 : vector<8x512xf32>
    %120 = arith.mulf %114, %119 : vector<8x512xf32>
    %121 = arith.mulf %120, %112 : vector<8x512xf32>
    %cst_22 = arith.constant dense<0.000000e+00> : vector<4x512xf32>
    %122 = tpu.matmul %11, %121, %cst_22 {dimension_numbers = #tpu.dot_dimension_numbers<[1], [0], [0], [1], [0, 0, 1, 1], [], []>} : vector<4x8xf32>, vector<8x512xf32>, vector<4x512xf32> -> vector<4x512xf32>
    %123 = vector.broadcast %12 : vector<4x1xf32> to vector<4x512xf32>
    %124 = arith.addf %122, %123 : vector<4x512xf32>
    %125 = vector.extract_strided_slice %124 {offsets = [0, 0], sizes = [4, 256], strides = [1, 1]} : vector<4x512xf32> to vector<4x256xf32>
    %c0_23 = arith.constant 0 : index
    %c0_24 = arith.constant 0 : index
    %c0_25 = arith.constant 0 : index
    %126 = vector.load %arg4[%c0_23, %c0_24, %c0_25] : memref<2x4x256xf32, #tpu.memory_space<vmem>>, vector<1x4x256xf32>
    %127 = vector.shape_cast %126 : vector<1x4x256xf32> to vector<4x256xf32>
    %128 = vector.shape_cast %125 : vector<4x256xf32> to vector<1x4x256xf32>
    tpu.vector_store %arg4[%c0_23, %c0_24, %c0_25], %128 {strides = array<i32>} : memref<2x4x256xf32, #tpu.memory_space<vmem>>, vector<1x4x256xf32>,
    %129 = vector.extract_strided_slice %124 {offsets = [0, 256], sizes = [4, 256], strides = [1, 1]} : vector<4x512xf32> to vector<4x256xf32>
    %c1_26 = arith.constant 1 : index
    %c0_27 = arith.constant 0 : index
    %c0_28 = arith.constant 0 : index
    %130 = vector.load %arg4[%c1_26, %c0_27, %c0_28] : memref<2x4x256xf32, #tpu.memory_space<vmem>>, vector<1x4x256xf32>
    %131 = vector.shape_cast %130 : vector<1x4x256xf32> to vector<4x256xf32>
    %132 = vector.shape_cast %129 : vector<4x256xf32> to vector<1x4x256xf32>
    tpu.vector_store %arg4[%c1_26, %c0_27, %c0_28], %132 {strides = array<i32>} : memref<2x4x256xf32, #tpu.memory_space<vmem>>, vector<1x4x256xf32>,
    return
  }
  func.func @transform_0(%arg0: i32) -> (i32, i32, i32) {
    %c0_i32 = arith.constant 0 : i32
    %c0_i32_0 = arith.constant 0 : i32
    %c0_i32_1 = arith.constant 0 : i32
    %c0_i32_2 = arith.constant 0 : i32
    return %c0_i32, %c0_i32_0, %c0_i32_1 : i32, i32, i32
  }
  func.func @transform_1(%arg0: i32) -> (i32, i32) {
    %c0_i32 = arith.constant 0 : i32
    %c0_i32_0 = arith.constant 0 : i32
    %c0_i32_1 = arith.constant 0 : i32
    return %c0_i32, %c0_i32_0 : i32, i32
  }
  func.func @transform_2(%arg0: i32) -> (i32, i32) {
    %c0_i32 = arith.constant 0 : i32
    %c0_i32_0 = arith.constant 0 : i32
    %c0_i32_1 = arith.constant 0 : i32
    return %c0_i32, %c0_i32_0 : i32, i32
  }
  func.func @transform_3(%arg0: i32) -> (i32, i32, i32) {
    %c0_i32 = arith.constant 0 : i32
    %c0_i32_0 = arith.constant 0 : i32
    %c0_i32_1 = arith.constant 0 : i32
    %c0_i32_2 = arith.constant 0 : i32
    return %c0_i32, %c0_i32_0, %c0_i32_1 : i32, i32, i32
  }
}

</mosaic_0001>

<bundles_post_ra>
// kernel: squeeze.4
= control target key start
LH: loop header
LB: loop body
LE: loop exit
PB: predicated region body
PF: predicated region fallthrough
CT: control target
= control target key end

     0   :  { %vm17_vm0 = vcmask 130048   ;;  %s62_s0 = inlined_call_operand.vmem [shape: f32[16,3,3], index: 0, kind: input, shape index: {}]   ;;  %s63_s1 = inlined_call_operand.vmem [shape: f32[16,9], index: 1, kind: output, shape index: {}]  }
   0x1   :  { %v30_v0 = vld [vmem:[%s62_s0 + $0x8] sm:$0xf]  ;;  %v31_v1 = vld [vmem:[%s62_s0 + $0x4] sm:$0xf]  ;;  %v14_v2 = vld [vmem:[%s62_s0] sm:$0xf] }
   0x2   :  { %9 = vst [vmem:[#allocation0] sm:$0xf] %v30_v0  ;;  %13 = vst [vmem:[#allocation0 + $0x10] sm:$0xf] %v31_v1 }
   0x3   :  { %15 = vst [vmem:[#allocation0 + $0x8] sm:$0xf] %v14_v2 }
   0x9   :  { %v20_v4 = vld [vmem:[#allocation0 + $0x10] sm:$0x7]   ;;  %v25_v5 = vld [vmem:[#allocation0] sm:$0x7]  }
   0xa   :  { %v16_v3 = vld [vmem:[#allocation0 + $0x8] sm:$0x7]   ;;  %32 = vst.msk [vmem:[%s63_s1 + $0x3] sm:$0x7] %vm17_vm0, %v20_v4   ;;  %33 = vst.msk [vmem:[%s63_s1 + $0x6] sm:$0x7] %vm17_vm0, %v25_v5  }
   0xb   :  { %18 = vst.msk [vmem:[%s63_s1] sm:$0x7] %vm17_vm0, %v16_v3  }

// kernel: feedforward_pallas.1
= control target key start
LH: loop header
LB: loop body
LE: loop exit
PB: predicated region body
PF: predicated region fallthrough
CT: control target
= control target key end

     0   :  { %vm39_vm0 = vcmask 1043456   ;;  %v1050_v2 = vmov 0.0   ;;  %v1051_v6 = vmov 5   ;;  %vm34_vm1 = vcmask 31744   ;;  %s1063_s19 = smov 17   ;;  %s1064_s20 = smov 15   ;;  %s1914_s0 = inlined_call_operand.vmem [shape: f32[2,4,256], index: 0, kind: input, shape index: {}]   ;;  %s1915_s1 = inlined_call_operand.vmem [shape: f32[16,15], index: 1, kind: input, shape index: {}]   ;;  %s1916_s2 = inlined_call_operand.vmem [shape: f32[4,9], index: 2, kind: input, shape index: {}]   ;;  %s1917_s3 = inlined_call_operand.vmem [shape: f32[2,4,256], index: 3, kind: output, shape index: {}]  }
   0x1   :  { %v14_v0 = vld [vmem:[%s1914_s0] sm:$0xff]  ;;  %v988_v1 = vld [vmem:[%s1914_s0 + $0x8] sm:$0xff]  ;;  %112 = vmatprep.mubr.f32.mxu0 %v1050_v2  ;;  %189 = vmatprep.mubr.f32.mxu1 %v1050_v2  ;;  %v1052_v8 = vmov 14   ;;  %v1053_v9 = vmov 4   ;;  %v1054_v10 = vmov 8   ;;  %v1055_v11 = vmov 6  }
   0x2   :  { %v18_v3 = vcombine.high %v14_v0, %v14_v0  ;;  %v20_v4 = vcombine.high %v988_v1, %v988_v1  ;;  %v21_v5 = vld [vmem:[%s1915_s1] sm:$0xff]  ;;  %1021 = vset.pattern.permute.xlu1 %v1051_v6  ;;  %v22_v7 = vld [vmem:[%s1915_s1 + $0x8] sm:$0xff]  ;;  %1020 = vset.pattern.permute.xlu0 %v1053_v9  ;;  %v1056_v12 = vmov 9   ;;  %v1057_v13 = vmov 7   ;;  %s1062_s1 = smov 1   ;;  %s1065_s21 = smov 16  }
   0x3   :  { %297 = vperm.xlu1 %1021, %v21_v5   ;;  %26 = vperm.xlu0 %1020, %v21_v5   ;;  %v1058_v14 = vmov 10   ;;  %v1059_v15 = vmov 12   ;;  %v1060_v16 = vmov 11   ;;  %v1061_v17 = vmov 13   ;;  %s1066_s22 = smov 127   ;;  %s1067_s23 = smov 113  }
   0x4   :  { %989 = vmatprep.subr.msk.mxu0 %vm39_vm0, %v18_v3  ;;  %993 = vmatprep.subr.msk.mxu1 %vm39_vm0, %v20_v4  ;;  %s1068_s24 = smov 112   ;;  %s1069_s25 = smov 111   ;;  %v202_v59 = vlaneseq  ;;  %v1260_v62 = vld [vmem:[%s1916_s2] sm:$0xf] }
   0x5   :  { %990 = vmatpush1.msk.msra.mxu0 %vm39_vm0, %v14_v0  ;;  %994 = vmatpush1.msk.msra.mxu1 %vm39_vm0, %v988_v1  ;;  %1941 = vst [vmem:[#allocation4_spill] sm:$0xff] %v1260_v62 }
   0x6   :  { %991 = vmatmul.mubr.msk.f32.vlgmr.msra.gmra.mxu0 %vm34_vm1, %v21_v5  ;;  %995 = vmatmul.mubr.msk.f32.vlgmr.msra.gmra.mxu1 %vm34_vm1, %v21_v5  ;;  %v1262_v63 = vand.u32 127, %v202_v59 }
   0x7   :  { %118 = vmatprep.mubr.f32.mxu0 %v1050_v2  ;;  %195 = vmatprep.mubr.f32.mxu1 %v1050_v2 }
   0x8   :  { %1022 = vset.pattern.permute.xlu1 %v1052_v8  ;;  %31 = vperm.xlu0 %1020, %v22_v7   ;;  %vm1925_vm2 = vcmp.lt.s32.totalorder %v1262_v63, 17  ;;  %v1276_v3 = vadd.s32 128, %v1262_v63  ;;  %vm1926_vm5 = vcmp.lt.s32.totalorder %v1262_v63, 1  ;;  %vm1919_vm12 = vcmp.lt.s32.totalorder %v1262_v63, 16 }
   0x9   :  { %248 = vperm.xlu1 %1022, %v21_v5   ;;  %vm1922_vm14 = vcmp.lt.s32.totalorder %v1262_v63, 15 }
   0xa   :  { %992 = vmatmul.mubr.msk.f32.gmra.mxu0 %vm34_vm1, %v22_v7  ;;  %996 = vmatmul.mubr.msk.f32.gmra.mxu1 %vm34_vm1, %v22_v7 }
   0xb   :  { %895 = vmatprep.mubr.f32.mxu0 %v1050_v2  ;;  %966 = vmatprep.mubr.f32.mxu1 %v1050_v2  ;;  %v1270_v2 = vadd.s32 256, %v1262_v63 }
   0xc   :  { %1023 = vset.pattern.permute.xlu0 %v1055_v11 }
   0xd   :  { %1024 = vset.pattern.permute.xlu1 %v1054_v10  ;;  %362 = vperm.xlu0 %1023, %v21_v5   ;;  %v213_v9 = vand.u32 15, %v1270_v2 }
   0xe   :  { %492 = vperm.xlu1 %1024, %v21_v5  }
   0xf   :  { %vm1300_vm4 = vcmp.ge.s32.totalorder %v213_v9, 1  ;;  %vm1406_vm13 = vcmp.le.s32.totalorder %v213_v9, 14 }
  0x11   :  { %1026 = vset.pattern.permute.xlu0 %v1057_v13 }
  0x12   :  { %1025 = vset.pattern.permute.xlu1 %v1056_v12  ;;  %427 = vperm.xlu0 %1026, %v21_v5  }
  0x13   :  { %508 = vperm.xlu1 %1025, %v21_v5  }
  0x16   :  { %1029 = vset.pattern.permute.xlu0 %v1059_v15 }
  0x17   :  { %1027 = vset.pattern.permute.xlu1 %v1058_v14  ;;  %695 = vperm.xlu0 %1029, %v21_v5  }
  0x18   :  { %573 = vperm.xlu1 %1027, %v21_v5  }
  0x1b   :  { %1030 = vset.pattern.permute.xlu0 %v1051_v6 }
  0x1c   :  { %1028 = vset.pattern.permute.xlu1 %v1060_v16  ;;  %301 = vperm.xlu0 %1030, %v22_v7  }
  0x1d   :  { %638 = vperm.xlu1 %1028, %v21_v5  }
  0x20   :  { %1035 = vset.pattern.permute.xlu0 %v1058_v14 }
  0x21   :  { %1031 = vset.pattern.permute.xlu1 %v1052_v8  ;;  %577 = vperm.xlu0 %1035, %v22_v7  }
  0x22   :  { %252 = vperm.xlu1 %1031, %v22_v7  }
  0x25   :  { %1036 = vset.pattern.permute.xlu0 %v1061_v17 }
  0x26   :  { %1032 = vset.pattern.permute.xlu1 %v1055_v11  ;;  %760 = vperm.xlu0 %1036, %v21_v5   ;;  %v209_v5 = vand.u32 255, %v1270_v2  ;;  %v1288_v11 = vadd.s32 384, %v1262_v63 }
  0x27   :  { %366 = vperm.xlu1 %1032, %v22_v7  }
  0x28   :  { %vm1290_vm3 = vcmp.ge.s32.totalorder %v209_v5, 16 }
  0x29   :  { %vm1924_vm7 = vmand %vm1290_vm3, %vm1300_vm4 }
  0x2a   :  { %764 = vperm.xlu0 %1036, %v22_v7   ;;  %vm1920_vm0 = vmand %vm1290_vm3, %vm1406_vm13 }
  0x2b   :  { %1033 = vset.pattern.permute.xlu1 %v1056_v12 }
  0x2c   :  { %512 = vperm.xlu1 %1033, %v22_v7  }
  0x2e   :  { %1039 = vset.pattern.permute.xlu0 %v1054_v10  ;;  %v212_v10 = vand.u32 15, %v1276_v3 }
  0x2f   :  { %496 = vperm.xlu0 %1039, %v22_v7  }
  0x30   :  { %1034 = vset.pattern.permute.xlu1 %v1057_v13  ;;  %vm1311_vm6 = vcmp.ge.s32.totalorder %v212_v10, 1  ;;  %vm1423_vm15 = vcmp.le.s32.totalorder %v212_v10, 14 }
  0x31   :  { %431 = vperm.xlu1 %1034, %v22_v7  }
  0x35   :  { %1037 = vset.pattern.permute.xlu1 %v1060_v16 }
  0x36   :  { %642 = vperm.xlu1 %1037, %v22_v7  }
  0x3a   :  { %1038 = vset.pattern.permute.xlu1 %v1059_v15 }
  0x3b   :  { %699 = vperm.xlu1 %1038, %v22_v7  }
  0x7e   :  { %v1106_v18 = vpop.permute.xlu1 %297  ;;  %v27_v21 = vpop.permute.xlu0 %26 }
  0x83   :  { %v32_v35 = vpop.permute.xlu0 %31 }
  0x84   :  { %v1108_v19 = vpop.permute.xlu1 %248 }
  0x88   :  { %v1173_v39 = vpop.permute.xlu0 %362 }
  0x89   :  { %v1110_v20 = vpop.permute.xlu1 %492 }
  0x8d   :  { %v1183_v41 = vpop.permute.xlu0 %427 }
  0x8e   :  { %v1112_v26 = vpop.permute.xlu1 %508 }
  0x92   :  { %v1193_v43 = vpop.permute.xlu0 %695 }
  0x93   :  { %v1175_v40 = vpop.permute.xlu1 %573 }
  0x97   :  { %v1205_v48 = vpop.permute.xlu0 %301 }
  0x98   :  { %v1187_v42 = vpop.permute.xlu1 %638 }
  0x9c   :  { %v1217_v51 = vpop.permute.xlu0 %577 }
  0x9d   :  { %v1195_v45 = vpop.permute.xlu1 %252 }
  0xa1   :  { %v1229_v54 = vpop.permute.xlu0 %760 }
  0xa2   :  { %v1209_v49 = vpop.permute.xlu1 %366 }
  0xa5   :  { %v1239_v56 = vpop.permute.xlu0 %764 }
  0xa6   :  { %1940 = vst [vmem:[#allocation3_spill] sm:$0xff] %v1239_v56 }
  0xa7   :  { %v1219_v52 = vpop.permute.xlu1 %512 }
  0xaa   :  { %v1249_v58 = vpop.permute.xlu0 %496 }
  0xac   :  { %v1227_v53 = vpop.permute.xlu1 %431 }
  0xb1   :  { %v1237_v55 = vpop.permute.xlu1 %642 }
  0xb2   :  { %1939 = vst [vmem:[#allocation2_spill] sm:$0xff] %v1237_v55 }
  0xb6   :  { %v1247_v57 = vpop.permute.xlu1 %699 }
  0xc6   :  { %v114_v22 = vpop.f32.mrf.mxu0  ;;  %v191_v23 = vpop.f32.mrf.mxu1 }
  0xc7   :  { %v115_v24 = vadd.f32 %v114_v22, %v27_v21  ;;  %v192_v25 = vadd.f32 %v191_v23, %v27_v21  ;;  %v211_v22 = vand.u32 15, %v1262_v63 }
  0xc8   :  { %v116_v27 = vpop.f32.mrf.mxu0  ;;  %v193_v32 = vpop.f32.mrf.mxu1 }
  0xc9   :  { %v117_v28 = vadd.f32 %v116_v27, %v27_v21  ;;  %450 = vrot.lane.b32.xlu1 %v115_v24, %s1062_s1  ;;  %255 = vrot.lane.b32.xlu0 %v115_v24, %s1063_s19  ;;  %v1117_v29 = vmul.f32 %v1112_v26, %v192_v25  ;;  %v1120_v30 = vmul.f32 %v1112_v26, %v115_v24  ;;  %vm1330_vm9 = vcmp.ge.s32.totalorder %v211_v22, 1 }
  0xca   :  { %v1129_v33 = vadd.f32 %v193_v32, %v27_v21  ;;  %v120_v34 = vpop.f32.mrf.mxu0  ;;  %v197_v37 = vpop.f32.mrf.mxu1  ;;  %v207_v21 = vand.u32 255, %v1262_v63  ;;  %vm1433_vm1 = vcmp.le.s32.totalorder %v211_v22, 14 }
  0xcb   :  { %v1123_v31 = vmul.f32 %v1112_v26, %v117_v28  ;;  %v1159_v36 = vadd.f32 %v120_v34, %v32_v35  ;;  %v1164_v38 = vadd.f32 %v197_v37, %v32_v35 }
  0xcc   :  { %v122_v44 = vpop.f32.mrf.mxu0  ;;  %v199_v47 = vpop.f32.mrf.mxu1  ;;  %vm1324_vm8 = vcmp.ge.s32.totalorder %v207_v21, 16  ;;  %v518_v5 = vmul.f32 %v1112_v26, %v1129_v33 }
  0xcd   :  { %385 = vrot.lane.b32.xlu1 %v115_v24, %s1064_s20  ;;  %263 = vrot.lane.b32.xlu0 %v192_v25, %s1063_s19  ;;  %v1201_v46 = vadd.f32 %v122_v44, %v32_v35  ;;  %v1211_v50 = vadd.f32 %v199_v47, %v32_v35  ;;  %vm1918_vm11 = vmand %vm1324_vm8, %vm1330_vm9 }
  0xd1   :  { %259 = vrot.lane.b32.xlu1 %v117_v28, %s1063_s19  ;;  %458 = vrot.lane.b32.xlu0 %v192_v25, %s1062_s1 }
  0xd5   :  { %267 = vrot.lane.b32.xlu1 %v1129_v33, %s1063_s19  ;;  %320 = vrot.lane.b32.xlu0 %v115_v24, %s1065_s21 }
  0xd9   :  { %454 = vrot.lane.b32.xlu1 %v117_v28, %s1062_s1  ;;  %328 = vrot.lane.b32.xlu0 %v192_v25, %s1065_s21 }
  0xdd   :  { %462 = vrot.lane.b32.xlu1 %v1129_v33, %s1062_s1  ;;  %393 = vrot.lane.b32.xlu0 %v192_v25, %s1064_s20 }
  0xe1   :  { %324 = vrot.lane.b32.xlu1 %v117_v28, %s1065_s21  ;;  %531 = vrot.lane.b32.xlu0 %v115_v24, %s1066_s22 }
  0xe5   :  { %332 = vrot.lane.b32.xlu1 %v1129_v33, %s1065_s21  ;;  %539 = vrot.lane.b32.xlu0 %v192_v25, %s1066_s22 }
  0xe9   :  { %389 = vrot.lane.b32.xlu1 %v117_v28, %s1064_s20  ;;  %596 = vrot.lane.b32.xlu0 %v115_v24, %s1067_s23 }
  0xed   :  { %397 = vrot.lane.b32.xlu1 %v1129_v33, %s1064_s20  ;;  %604 = vrot.lane.b32.xlu0 %v192_v25, %s1067_s23 }
  0xf1   :  { %535 = vrot.lane.b32.xlu1 %v117_v28, %s1066_s22  ;;  %653 = vrot.lane.b32.xlu0 %v115_v24, %s1068_s24 }
  0xf5   :  { %543 = vrot.lane.b32.xlu1 %v1129_v33, %s1066_s22  ;;  %661 = vrot.lane.b32.xlu0 %v192_v25, %s1068_s24 }
  0xf9   :  { %600 = vrot.lane.b32.xlu1 %v117_v28, %s1067_s23  ;;  %718 = vrot.lane.b32.xlu0 %v115_v24, %s1069_s25  ;;  %v214_v24 = vand.u32 15, %v1288_v11 }
  0xfb   :  { %vm1351_vm10 = vcmp.ge.s32.totalorder %v214_v24, 1 }
  0xfd   :  { %608 = vrot.lane.b32.xlu1 %v1129_v33, %s1067_s23  ;;  %726 = vrot.lane.b32.xlu0 %v192_v25, %s1069_s25 }
 0x101   :  { %657 = vrot.lane.b32.xlu1 %v117_v28, %s1068_s24  ;;  %452 = vrot.lane.b32.xlu0 %v1159_v36, %s1062_s1 }
 0x105   :  { %665 = vrot.lane.b32.xlu1 %v1129_v33, %s1068_s24  ;;  %460 = vrot.lane.b32.xlu0 %v1164_v38, %s1062_s1 }
 0x109   :  { %722 = vrot.lane.b32.xlu1 %v117_v28, %s1069_s25  ;;  %322 = vrot.lane.b32.xlu0 %v1159_v36, %s1065_s21 }
 0x10d   :  { %730 = vrot.lane.b32.xlu1 %v1129_v33, %s1069_s25  ;;  %330 = vrot.lane.b32.xlu0 %v1164_v38, %s1065_s21 }
 0x111   :  { %257 = vrot.lane.b32.xlu1 %v1159_v36, %s1063_s19  ;;  %395 = vrot.lane.b32.xlu0 %v1164_v38, %s1064_s20 }
 0x115   :  { %265 = vrot.lane.b32.xlu1 %v1164_v38, %s1063_s19  ;;  %533 = vrot.lane.b32.xlu0 %v1159_v36, %s1066_s22 }
 0x119   :  { %387 = vrot.lane.b32.xlu1 %v1159_v36, %s1064_s20  ;;  %541 = vrot.lane.b32.xlu0 %v1164_v38, %s1066_s22 }
 0x11d   :  { %456 = vrot.lane.b32.xlu1 %v1201_v46, %s1062_s1  ;;  %598 = vrot.lane.b32.xlu0 %v1159_v36, %s1067_s23 }
 0x121   :  { %464 = vrot.lane.b32.xlu1 %v1211_v50, %s1062_s1  ;;  %606 = vrot.lane.b32.xlu0 %v1164_v38, %s1067_s23 }
 0x125   :  { %326 = vrot.lane.b32.xlu1 %v1201_v46, %s1065_s21  ;;  %655 = vrot.lane.b32.xlu0 %v1159_v36, %s1068_s24 }
 0x129   :  { %334 = vrot.lane.b32.xlu1 %v1211_v50, %s1065_s21  ;;  %663 = vrot.lane.b32.xlu0 %v1164_v38, %s1068_s24 }
 0x12d   :  { %391 = vrot.lane.b32.xlu1 %v1201_v46, %s1064_s20  ;;  %261 = vrot.lane.b32.xlu0 %v1201_v46, %s1063_s19 }
 0x131   :  { %399 = vrot.lane.b32.xlu1 %v1211_v50, %s1064_s20  ;;  %269 = vrot.lane.b32.xlu0 %v1211_v50, %s1063_s19 }
 0x135   :  { %537 = vrot.lane.b32.xlu1 %v1201_v46, %s1066_s22  ;;  %720 = vrot.lane.b32.xlu0 %v1159_v36, %s1069_s25 }
 0x139   :  { %545 = vrot.lane.b32.xlu1 %v1211_v50, %s1066_s22  ;;  %728 = vrot.lane.b32.xlu0 %v1164_v38, %s1069_s25 }
 0x13b   :  { %v451_v60 = vpop.permute.xlu1 %450  ;;  %v256_v61 = vpop.permute.xlu0 %255 }
 0x13d   :  { %602 = vrot.lane.b32.xlu1 %v1201_v46, %s1067_s23  ;;  %825 = vperm.xlu0 %1039, %v1260_v62  }
 0x13f   :  { %v1267_v0 = vpop.permute.xlu1 %385  ;;  %v264_v1 = vpop.permute.xlu0 %263 }
 0x141   :  { %610 = vrot.lane.b32.xlu1 %v1211_v50, %s1067_s23 }
 0x143   :  { %v260_v4 = vpop.permute.xlu1 %259  ;;  %v459_v8 = vpop.permute.xlu0 %458 }
 0x144   :  { %v274_v6 = vsel %vm1925_vm2, %v260_v4, %v264_v1  ;;  %v276_v7 = vsel %vm1925_vm2, %v256_v61, %v260_v4 }
 0x145   :  { %659 = vrot.lane.b32.xlu1 %v1201_v46, %s1068_s24  ;;  %v289_v47 = vsel %vm1311_vm6, %v276_v7, 0.0 }
 0x146   :  { %v305_v26 = vmul.f32 %v1106_v18, %v289_v47 }
 0x147   :  { %v268_v12 = vpop.permute.xlu1 %267  ;;  %v321_v16 = vpop.permute.xlu0 %320 }
 0x148   :  { %v272_v14 = vsel %vm1925_vm2, %v264_v1, %v268_v12  ;;  %v278_v15 = vsel %vm1925_vm2, %v268_v12, %v256_v61  ;;  %v290_v1 = vsel %vm1924_vm7, %v274_v6, 0.0  ;;  %vm1927_vm7 = vcmp.lt.s32.totalorder %v1262_v63, 111 }
 0x149   :  { %667 = vrot.lane.b32.xlu1 %v1211_v50, %s1068_s24 }
 0x14b   :  { %v455_v25 = vpop.permute.xlu1 %454  ;;  %v329_v32 = vpop.permute.xlu0 %328 }
 0x14c   :  { %v469_v27 = vsel %vm1926_vm5, %v455_v25, %v459_v8  ;;  %v471_v28 = vsel %vm1926_vm5, %v451_v60, %v455_v25 }
 0x14d   :  { %v484_v37 = vsel %vm1311_vm6, %v471_v28, 0.0  ;;  %v485_v44 = vsel %vm1300_vm4, %v469_v27, 0.0  ;;  %724 = vrot.lane.b32.xlu1 %v1201_v46, %s1069_s25 }
 0x14e   :  { %v500_v59 = vmul.f32 %v1110_v20, %v484_v37  ;;  %v501_v61 = vmul.f32 %v1110_v20, %v485_v44  ;;  %v288_v37 = vsel %vm1918_vm11, %v278_v15, 0.0  ;;  %vm1455_vm11 = vcmp.le.s32.totalorder %v214_v24, 14 }
 0x14f   :  { %v463_v7 = vpop.permute.xlu1 %462  ;;  %v394_v27 = vpop.permute.xlu0 %393 }
 0x150   :  { %v1362_v12 = vadd.f32 %v1123_v31, %v500_v59  ;;  %v1365_v6 = vadd.f32 %v1117_v29, %v501_v61  ;;  %v467_v21 = vsel %vm1926_vm5, %v459_v8, %v463_v7  ;;  %v473_v25 = vsel %vm1926_vm5, %v463_v7, %v451_v60 }
 0x151   :  { %v483_v33 = vsel %vm1330_vm9, %v473_v25, 0.0  ;;  %v486_v28 = vsel %vm1351_vm10, %v467_v21, 0.0  ;;  %732 = vrot.lane.b32.xlu1 %v1211_v50, %s1069_s25  ;;  %v306_v29 = vmul.f32 %v1106_v18, %v290_v1  ;;  %v291_v31 = vsel %vm1351_vm10, %v272_v14, 0.0 }
 0x152   :  { %v499_v60 = vmul.f32 %v1110_v20, %v483_v33  ;;  %v502_v8 = vmul.f32 %v1110_v20, %v486_v28  ;;  %v313_v20 = vadd.f32 %v305_v26, %v1108_v19  ;;  %v307_v7 = vmul.f32 %v1106_v18, %v291_v31 }
 0x153   :  { %v325_v44 = vpop.permute.xlu1 %324  ;;  %v532_v1 = vpop.permute.xlu0 %531 }
 0x154   :  { %v523_v47 = vadd.f32 %v1120_v30, %v499_v60  ;;  %v1390_v59 = vadd.f32 %v518_v5, %v502_v8  ;;  %v339_v61 = vsel %vm1919_vm12, %v325_v44, %v329_v32  ;;  %v341_v14 = vsel %vm1919_vm12, %v321_v16, %v325_v44 }
 0x155   :  { %v355_v21 = vsel %vm1290_vm3, %v339_v61, 0.0  ;;  %v370_v15 = vmul.f32 %v1173_v39, %v341_v14  ;;  %v314_v30 = vadd.f32 %v306_v29, %v1108_v19  ;;  %v304_v5 = vmul.f32 %v1106_v18, %v288_v37 }
 0x156   :  { %v371_v25 = vmul.f32 %v1173_v39, %v355_v21  ;;  %v315_v18 = vadd.f32 %v307_v7, %v1108_v19 }
 0x157   :  { %v378_v33 = vadd.f32 %v370_v15, %v313_v20  ;;  %v333_v28 = vpop.permute.xlu1 %332  ;;  %v540_v29 = vpop.permute.xlu0 %539  ;;  %v312_v2 = vadd.f32 %v304_v5, %v1108_v19 }
 0x158   :  { %v379_v26 = vadd.f32 %v371_v25, %v314_v30  ;;  %v337_v31 = vsel %vm1919_vm12, %v329_v32, %v333_v28  ;;  %v343_v8 = vsel %vm1919_vm12, %v333_v28, %v321_v16  ;;  %vm1921_vm12 = vmand %vm1324_vm8, %vm1433_vm1 }
 0x159   :  { %v353_v37 = vsel %vm1324_vm8, %v343_v8, 0.0  ;;  %v372_v44 = vmul.f32 %v1173_v39, %v337_v31 }
 0x15a   :  { %v369_v9 = vmul.f32 %v1173_v39, %v353_v37 }
 0x15b   :  { %v380_v16 = vadd.f32 %v372_v44, %v315_v18  ;;  %v390_v61 = vpop.permute.xlu1 %389  ;;  %v1442_v20 = vpop.permute.xlu0 %596 }
 0x15c   :  { %v377_v19 = vadd.f32 %v369_v9, %v312_v2  ;;  %v404_v39 = vsel %vm1922_vm14, %v390_v61, %v394_v27  ;;  %v406_v10 = vsel %vm1922_vm14, %v1267_v0, %v390_v61 }
 0x15d   :  { %v419_v7 = vsel %vm1423_vm15, %v406_v10, 0.0  ;;  %v420_v22 = vsel %vm1920_vm0, %v404_v39, 0.0  ;;  %vm1923_vm0 = vcmp.lt.s32.totalorder %v1262_v63, 127 }
 0x15e   :  { %v435_v21 = vmul.f32 %v1183_v41, %v419_v7  ;;  %v436_v15 = vmul.f32 %v1183_v41, %v420_v22 }
 0x15f   :  { %v398_v5 = vpop.permute.xlu1 %397  ;;  %v1468_v18 = vpop.permute.xlu0 %604 }
 0x160   :  { %v443_v25 = vadd.f32 %v435_v21, %v378_v33  ;;  %v444_v28 = vadd.f32 %v436_v15, %v379_v26  ;;  %v402_v31 = vsel %vm1922_vm14, %v394_v27, %v398_v5  ;;  %v408_v8 = vsel %vm1922_vm14, %v398_v5, %v1267_v0 }
 0x161   :  { %v418_v24 = vsel %vm1921_vm12, %v408_v8, 0.0  ;;  %v421_v37 = vsel %vm1455_vm11, %v402_v31, 0.0  ;;  %vm1930_vm12 = vcmp.lt.s32.totalorder %v1262_v63, 112 }
 0x162   :  { %v434_v33 = vmul.f32 %v1183_v41, %v418_v24  ;;  %v437_v27 = vmul.f32 %v1183_v41, %v421_v37 }
 0x163   :  { %v536_v26 = vpop.permute.xlu1 %535  ;;  %v1484_v61 = vpop.permute.xlu0 %653 }
 0x164   :  { %v442_v44 = vadd.f32 %v434_v33, %v377_v19  ;;  %v445_v0 = vadd.f32 %v437_v27, %v380_v16  ;;  %v550_v2 = vsel %vm1923_vm0, %v536_v26, %v540_v29  ;;  %v552_v9 = vsel %vm1923_vm0, %v532_v1, %v536_v26 }
 0x165   :  { %v564_v39 = vsel %vm1433_vm1, %v552_v9, 0.0  ;;  %v565_v10 = vsel %vm1423_vm15, %v550_v2, 0.0 }
 0x166   :  { %v580_v7 = vmul.f32 %v1175_v40, %v564_v39  ;;  %v581_v41 = vmul.f32 %v1175_v40, %v565_v10 }
 0x167   :  { %v544_v19 = vpop.permute.xlu1 %543  ;;  %v1497_v5 = vpop.permute.xlu0 %661 }
 0x168   :  { %v588_v16 = vadd.f32 %v580_v7, %v523_v47  ;;  %v589_v22 = vadd.f32 %v581_v41, %v1362_v12  ;;  %v548_v21 = vsel %vm1923_vm0, %v540_v29, %v544_v19  ;;  %v554_v15 = vsel %vm1923_vm0, %v544_v19, %v532_v1 }
 0x169   :  { %v566_v31 = vsel %vm1406_vm13, %v548_v21, 0.0  ;;  %v567_v8 = vsel %vm1455_vm11, %v554_v15, 0.0  ;;  %vm612_vm0 = vcmp.lt.s32.totalorder %v1262_v63, 113  ;;  %v210_v21 = vand.u32 255, %v1288_v11 }
 0x16a   :  { %v1503_v24 = vadd.f32 %v588_v16, %v442_v44  ;;  %v1505_v37 = vadd.f32 %v589_v22, %v443_v25  ;;  %v582_v12 = vmul.f32 %v1175_v40, %v566_v31  ;;  %v583_v47 = vmul.f32 %v1175_v40, %v567_v8 }
 0x16b   :  { %v601_v29 = vpop.permute.xlu1 %600  ;;  %v719_v27 = vpop.permute.xlu0 %718  ;;  %v208_v40 = vand.u32 255, %v1276_v3 }
 0x16c   :  { %v590_v33 = vadd.f32 %v582_v12, %v1365_v6  ;;  %v591_v1 = vadd.f32 %v583_v47, %v1390_v59  ;;  %v1962_v6 = vmov 0  ;;  %v615_v22 = vsel %vm612_vm0, %v601_v29, %v1468_v18 }
 0x16d   :  { %vm1523_vm14 = vcmp.lt.s32.totalorder %v208_v40, 240 }
 0x16e   :  { %v1511_v26 = vadd.f32 %v590_v33, %v444_v28  ;;  %v1513_v2 = vadd.f32 %v591_v1, %v445_v0  ;;  %v1963_v6 = vsel %vm1523_vm14, 4294967295, %v1962_v6  ;;  %vm1929_vm2 = vmand %vm1523_vm14, %vm1311_vm6  ;;  %v617_v0 = vsel %vm612_vm0, %v1442_v20, %v601_v29 }
 0x16f   :  { %v609_v9 = vpop.permute.xlu1 %608  ;;  %v727_v39 = vpop.permute.xlu0 %726  ;;  %vm1928_vm5 = vmand %vm1523_vm14, %vm1423_vm15  ;;  %v629_v11 = vsel %vm1330_vm9, %v617_v0, 0.0  ;;  %v630_v33 = vsel %vm1929_vm2, %v615_v22, 0.0 }
 0x170   :  { %v645_v0 = vmul.f32 %v1187_v42, %v629_v11  ;;  %v619_v11 = vsel %vm612_vm0, %v609_v9, %v1442_v20  ;;  %v613_v20 = vsel %vm612_vm0, %v1468_v18, %v609_v9 }
 0x173   :  { %v658_v44 = vpop.permute.xlu1 %657  ;;  %v1515_v10 = vpop.permute.xlu0 %452 }
 0x174   :  { %v672_v3 = vsel %vm1930_vm12, %v658_v44, %v1497_v5  ;;  %v674_v15 = vsel %vm1930_vm12, %v1484_v61, %v658_v44 }
 0x175   :  { %v687_v12 = vsel %vm1523_vm14, %v672_v3, 0.0  ;;  %v702_v1 = vmul.f32 %v1193_v43, %v674_v15  ;;  %v646_v15 = vmul.f32 %v1187_v42, %v630_v33  ;;  %vm1967_vm14 = vcmp.lt.s32.totalorder %v1262_v63, 112 }
 0x177   :  { %v666_v25 = vpop.permute.xlu1 %665  ;;  %v1517_v7 = vpop.permute.xlu0 %460 }
 0x178   :  { %v670_v18 = vsel %vm1967_vm14, %v1497_v5, %v666_v25  ;;  %vm1968_vm14 = vcmp.lt.s32.totalorder %v1262_v63, 1 }
 0x179   :  { %v704_v5 = vmul.f32 %v1193_v43, %v670_v18 }
 0x17b   :  { %v723_v41 = vpop.permute.xlu1 %722  ;;  %v1520_v19 = vpop.permute.xlu0 %322 }
 0x17c   :  { %v739_v16 = vsel %vm1927_vm7, %v719_v27, %v723_v41  ;;  %v737_v31 = vsel %vm1927_vm7, %v723_v41, %v727_v39  ;;  %vm1577_vm7 = vcmp.lt.s32.totalorder %v210_v21, 240  ;;  %v703_v41 = vmul.f32 %v1193_v43, %v687_v12 }
 0x17d   :  { %v751_v29 = vsel %vm1433_vm1, %v739_v16, 0.0  ;;  %v752_v44 = vsel %vm1928_vm5, %v737_v31, 0.0  ;;  %v676_v31 = vsel %vm1930_vm12, %v666_v25, %v1484_v61  ;;  %vm1938_vm5 = vmand %vm1577_vm7, %vm1351_vm10  ;;  %v710_v12 = vadd.f32 %v702_v1, %v645_v0 }
 0x17e   :  { %v767_v16 = vmul.f32 %v1229_v54, %v751_v29  ;;  %v768_v21 = vmul.f32 %v1229_v54, %v752_v44  ;;  %v711_v29 = vadd.f32 %v703_v41, %v646_v15  ;;  %vm1937_vm2 = vmand %vm1577_vm7, %vm1455_vm11  ;;  %vm1966_vm12 = vcmp.lt.s32.totalorder %v1262_v63, 111 }
 0x17f   :  { %v731_v59 = vpop.permute.xlu1 %730  ;;  %v1529_v28 = vpop.permute.xlu0 %330  ;;  %v689_v44 = vsel %vm1577_vm7, %v676_v31, 0.0  ;;  %v632_v0 = vsel %vm1938_vm5, %v619_v11, 0.0  ;;  %v631_v31 = vsel %vm1300_vm4, %v613_v20, 0.0  ;;  %vm1977_vm5 = vmand %vm1324_vm8, %vm1330_vm9 }
 0x180   :  { %v741_v61 = vsel %vm1966_vm12, %v731_v59, %v719_v27  ;;  %v775_v62 = vadd.f32 %v767_v16, %v710_v12  ;;  %v776_v41 = vadd.f32 %v768_v21, %v711_v29  ;;  %v735_v27 = vsel %vm1966_vm12, %v727_v39, %v731_v59  ;;  %vm1969_vm12 = vmmov %vm1968_vm14 }
 0x181   :  { %v754_v16 = vsel %vm1937_vm2, %v741_v61, 0.0  ;;  %v705_v9 = vmul.f32 %v1193_v43, %v689_v44  ;;  %v648_v39 = vmul.f32 %v1187_v42, %v632_v0  ;;  %v753_v11 = vsel %vm1406_vm13, %v735_v27, 0.0  ;;  %vm1970_vm2 = vmmov %vm1969_vm12 }
 0x182   :  { %v791_v21 = vadd.f32 %v1503_v24, %v775_v62  ;;  %v792_v59 = vadd.f32 %v1505_v37, %v776_v41  ;;  %v770_v29 = vmul.f32 %v1229_v54, %v754_v16  ;;  %v647_v44 = vmul.f32 %v1187_v42, %v631_v31 }
 0x183   :  { %v1556_v8 = vpop.permute.xlu1 %257  ;;  %v1560_v47 = vpop.permute.xlu0 %395  ;;  %v713_v25 = vadd.f32 %v705_v9, %v648_v39  ;;  %v769_v62 = vmul.f32 %v1229_v54, %v753_v11 }
 0x184   :  { %v803_v20 = vmul.f32 0.70710677, %v791_v21  ;;  %v804_v56 = vmul.f32 0.70710677, %v792_v59  ;;  %v712_v55 = vadd.f32 %v704_v5, %v647_v44 }
 0x185   :  { %v778_v0 = vadd.f32 %v770_v29, %v713_v25 }
 0x186   :  { %1042 = verf.f32 %v803_v20  ;;  %v777_v41 = vadd.f32 %v769_v62, %v712_v55  ;;  %v521_v62 = vmul.f32 %v1219_v52, %v1164_v38 }
 0x187   :  { %v1582_v3 = vpop.permute.xlu1 %265  ;;  %v1586_v22 = vpop.permute.xlu0 %533  ;;  %1044 = verf.f32 %v804_v56  ;;  %v1649_v43 = vadd.f32 %v1513_v2, %v778_v0 }
 0x188   :  { %v1654_v42 = vadd.f32 %v1511_v26, %v777_v41 }
 0x189   :  { %v806_v18 = vmul.f32 0.70710677, %v1649_v43 }
 0x18a   :  { %v805_v31 = vmul.f32 0.70710677, %v1654_v42 }
 0x18b   :  { %v1606_v33 = vpop.permute.xlu1 %387  ;;  %v1610_v1 = vpop.permute.xlu0 %541  ;;  %1046 = verf.f32 %v806_v18 }
 0x18c   :  { %1048 = verf.f32 %v805_v31 }
 0x18f   :  { %v457_v15 = vpop.permute.xlu1 %456  ;;  %v1634_v12 = vpop.permute.xlu0 %598 }
 0x190   :  { %v470_v56 = vsel %vm1968_vm14, %v457_v15, %v1517_v7  ;;  %v472_v2 = vsel %vm1969_vm12, %v1515_v10, %v457_v15  ;;  %vm1971_vm14 = vmmov %vm1970_vm2  ;;  %vm1972_vm12 = vcmp.lt.s32.totalorder %v1262_v63, 17 }
 0x191   :  { %v488_v29 = vsel %vm1311_vm6, %v472_v2, 0.0  ;;  %v489_v5 = vsel %vm1300_vm4, %v470_v56, 0.0 }
 0x192   :  { %v504_v18 = vmul.f32 %v1249_v58, %v488_v29  ;;  %v520_v29 = vmul.f32 %v1219_v52, %v1201_v46 }
 0x193   :  { %v465_v61 = vpop.permute.xlu1 %464  ;;  %v1644_v24 = vpop.permute.xlu0 %606 }
 0x194   :  { %v474_v39 = vsel %vm1970_vm2, %v465_v61, %v1515_v10  ;;  %v1043_v11 = vpop.eup %1042  ;;  %v468_v25 = vsel %vm1971_vm14, %v1517_v7, %v465_v61  ;;  %v519_v10 = vmul.f32 %v1219_v52, %v1159_v36  ;;  %v505_v7 = vmul.f32 %v1249_v58, %v489_v5  ;;  %vm1973_vm2 = vmmov %vm1972_vm12 }
 0x195   :  { %v1045_v44 = vpop.eup %1044  ;;  %v487_v0 = vsel %vm1330_vm9, %v474_v39, 0.0  ;;  %v490_v61 = vsel %vm1351_vm10, %v468_v25, 0.0  ;;  %vm1974_vm14 = vmmov %vm1973_vm2  ;;  %v811_v2 = vadd.f32 1.0, %v1043_v11  ;;  %v799_v39 = vmul.f32 0.5, %v791_v21 }
 0x196   :  { %v812_v56 = vadd.f32 1.0, %v1045_v44  ;;  %v522_v5 = vmul.f32 %v1219_v52, %v1211_v50  ;;  %v503_v25 = vmul.f32 %v1249_v58, %v487_v0  ;;  %v800_v11 = vmul.f32 0.5, %v792_v59 }
 0x197   :  { %v327_v37 = vpop.permute.xlu1 %326  ;;  %v1646_v27 = vpop.permute.xlu0 %655  ;;  %v528_v46 = vadd.f32 %v520_v29, %v504_v18  ;;  %v1724_v44 = vadd.f32 %v521_v62, %v505_v7 }
 0x198   :  { %v1729_v59 = vmul.f32 %v812_v56, %v800_v11  ;;  %v1047_v0 = vpop.eup %1046  ;;  %v527_v18 = vadd.f32 %v519_v10, %v503_v25 }
 0x19b   :  { %v1651_v16 = vpop.permute.xlu1 %334  ;;  %v1656_v54 = vpop.permute.xlu0 %663 }
 0x19f   :  { %v1659_v9 = vpop.permute.xlu1 %391  ;;  %v262_v55 = vpop.permute.xlu0 %261 }
 0x1a0   :  { %v277_v15 = vsel %vm1972_vm12, %v1556_v8, %v262_v55  ;;  %v275_v31 = vsel %vm1973_vm2, %v262_v55, %v1582_v3  ;;  %v506_v55 = vmul.f32 %v1249_v58, %v490_v61  ;;  %vm1975_vm12 = vmand %vm1290_vm3, %vm1300_vm4 }
 0x1a1   :  { %v293_v36 = vsel %vm1311_vm6, %v277_v15, 0.0  ;;  %v294_v15 = vsel %vm1975_vm12, %v275_v31, 0.0  ;;  %vm1978_vm12 = vcmp.lt.s32.totalorder %v1262_v63, 127 }
 0x1a2   :  { %v309_v52 = vmul.f32 %v1205_v48, %v293_v36  ;;  %v310_v31 = vmul.f32 %v1205_v48, %v294_v15  ;;  %v1739_v7 = vadd.f32 %v522_v5, %v506_v55  ;;  %v1049_v5 = vpop.eup %1048  ;;  %v1764_v15 = vadd.f32 1.0, %v1047_v0 }
 0x1a3   :  { %v1668_v26 = vpop.permute.xlu1 %399  ;;  %v270_v20 = vpop.permute.xlu0 %269 }
 0x1a4   :  { %v279_v38 = vsel %vm1974_vm14, %v270_v20, %v1556_v8  ;;  %v273_v8 = vsel %vm1973_vm2, %v1582_v3, %v270_v20  ;;  %vm1976_vm14 = vcmp.lt.s32.totalorder %v1262_v63, 16  ;;  %v1731_v20 = vmul.f32 %v811_v2, %v799_v39 }
 0x1a5   :  { %v340_v50 = vsel %vm1976_vm14, %v327_v37, %v1529_v28  ;;  %v292_v58 = vsel %vm1977_vm5, %v279_v38, 0.0  ;;  %vm1979_vm2 = vmmov %vm1976_vm14  ;;  %v295_v62 = vsel %vm1351_vm10, %v273_v8, 0.0  ;;  %vm1981_vm14 = vcmp.lt.s32.totalorder %v1262_v63, 15 }
 0x1a6   :  { %v342_v61 = vsel %vm1979_vm2, %v1520_v19, %v327_v37  ;;  %v359_v36 = vsel %vm1290_vm3, %v340_v50, 0.0  ;;  %vm1980_vm5 = vmmov %vm1979_vm2  ;;  %v308_v10 = vmul.f32 %v1205_v48, %v292_v58  ;;  %v407_v37 = vsel %vm1981_vm14, %v1606_v33, %v1659_v9 }
 0x1a7   :  { %v538_v41 = vpop.permute.xlu1 %537  ;;  %v344_v38 = vsel %vm1980_vm5, %v1651_v16, %v1520_v19  ;;  %v317_v2 = vadd.f32 %v309_v52, %v1195_v45  ;;  %v374_v19 = vmul.f32 %v1209_v49, %v342_v61  ;;  %v338_v25 = vsel %vm1979_vm2, %v1529_v28, %v1651_v16  ;;  %vm1982_vm5 = vmmov %vm1981_vm14 }
 0x1a8   :  { %v551_v3 = vsel %vm1978_vm12, %v538_v41, %v1610_v1  ;;  %v553_v39 = vsel %vm1978_vm12, %v1586_v22, %v538_v41  ;;  %v311_v55 = vmul.f32 %v1205_v48, %v295_v62  ;;  %v357_v8 = vsel %vm1324_vm8, %v344_v38, 0.0  ;;  %vm1983_vm14 = vmmov %vm1982_vm5 }
 0x1a9   :  { %v569_v29 = vsel %vm1423_vm15, %v551_v3, 0.0  ;;  %v405_v41 = vsel %vm1982_vm5, %v1659_v9, %v1560_v47  ;;  %v318_v11 = vadd.f32 %v310_v31, %v1195_v45  ;;  %v409_v50 = vsel %vm1983_vm14, %v1668_v26, %v1606_v33  ;;  %vm1984_vm12 = vmmov %vm1982_vm5 }
 0x1aa   :  { %v423_v48 = vsel %vm1423_vm15, %v407_v37, 0.0  ;;  %v316_v28 = vadd.f32 %v308_v10, %v1195_v45  ;;  %v568_v16 = vsel %vm1433_vm1, %v553_v39, 0.0  ;;  %v585_v52 = vmul.f32 %v1217_v51, %v569_v29  ;;  %vm1985_vm2 = vmand %vm1290_vm3, %vm1406_vm13 }
 0x1ab   :  { %v546_v21 = vpop.permute.xlu1 %545  ;;  %v375_v9 = vmul.f32 %v1209_v49, %v359_v36  ;;  %v382_v3 = vadd.f32 %v374_v19, %v317_v2  ;;  %v403_v0 = vsel %vm1984_vm12, %v1560_v47, %v1668_v26  ;;  %v1788_v33 = vadd.f32 1.0, %v1049_v5  ;;  %vm1986_vm5 = vmand %vm1324_vm8, %vm1433_vm1 }
 0x1ac   :  { %v373_v61 = vmul.f32 %v1209_v49, %v357_v8  ;;  %v424_v31 = vsel %vm1985_vm2, %v405_v41, 0.0  ;;  %v422_v62 = vsel %vm1986_vm5, %v409_v50, 0.0  ;;  %v319_v36 = vadd.f32 %v311_v55, %v1195_v45 }
 0x1ad   :  { %v376_v47 = vmul.f32 %v1209_v49, %v338_v25  ;;  %v439_v26 = vmul.f32 %v1227_v53, %v423_v48  ;;  %v383_v38 = vadd.f32 %v375_v9, %v318_v11  ;;  %v584_v10 = vmul.f32 %v1217_v51, %v568_v16  ;;  %v721_v25 = vpop.permute.xlu0 %720 }
 0x1ae   :  { %v425_v13 = vsel %vm1455_vm11, %v403_v0, 0.0  ;;  %v381_v37 = vadd.f32 %v373_v61, %v316_v28  ;;  %v593_v2 = vadd.f32 %v585_v52, %v528_v46  ;;  %vm1987_vm3 = vcmp.lt.s32.totalorder %v1262_v63, 127 }
 0x1af   :  { %v603_v56 = vpop.permute.xlu1 %602  ;;  %v549_v34 = vsel %vm1987_vm3, %v1610_v1, %v546_v21  ;;  %v440_v29 = vmul.f32 %v1227_v53, %v424_v31  ;;  %v438_v45 = vmul.f32 %v1227_v53, %v422_v62  ;;  %v447_v49 = vadd.f32 %v439_v26, %v382_v3  ;;  %vm1989_vm14 = vmmov %vm1987_vm3 }
 0x1b0   :  { %vm1988_vm8 = vcmp.lt.s32.totalorder %v1262_v63, 112  ;;  %v384_v19 = vadd.f32 %v376_v47, %v319_v36  ;;  %v555_v46 = vsel %vm1989_vm14, %v546_v21, %v1586_v22  ;;  %v616_v1 = vsel %vm612_vm0, %v603_v56, %v1644_v24 }
 0x1b1   :  { %v618_v55 = vsel %vm612_vm0, %v1634_v12, %v603_v56  ;;  %v441_v8 = vmul.f32 %v1227_v53, %v425_v13  ;;  %v592_v41 = vadd.f32 %v584_v10, %v527_v18  ;;  %v448_v11 = vadd.f32 %v440_v29, %v383_v38  ;;  %vm1990_vm12 = vmmov %vm1988_vm8  ;;  %v729_v47 = vpop.permute.xlu0 %728 }
 0x1b2   :  { %v570_v50 = vsel %vm1406_vm13, %v549_v34, 0.0  ;;  %v446_v48 = vadd.f32 %v438_v45, %v381_v37  ;;  %v788_v28 = vadd.f32 %v593_v2, %v447_v49  ;;  %vm1991_vm2 = vnez %v1963_v6  ;;  %vm1993_vm3 = vmmov %vm1988_vm8 }
 0x1b3   :  { %v611_v58 = vpop.permute.xlu1 %610  ;;  %v571_v56 = vsel %vm1455_vm11, %v555_v46, 0.0  ;;  %v633_v53 = vsel %vm1330_vm9, %v618_v55, 0.0  ;;  %vm1992_vm5 = vmand %vm1991_vm2, %vm1311_vm6  ;;  %v449_v9 = vadd.f32 %v441_v8, %v384_v19  ;;  %v586_v3 = vmul.f32 %v1217_v51, %v570_v50 }
 0x1b4   :  { %v634_v18 = vsel %vm1992_vm5, %v616_v1, 0.0  ;;  %v614_v0 = vsel %vm612_vm0, %v1644_v24, %v611_v58  ;;  %v620_v35 = vsel %vm612_vm0, %v611_v58, %v1634_v12  ;;  %vm1994_vm6 = vmmov %vm1993_vm3  ;;  %v787_v62 = vadd.f32 %v592_v41, %v446_v48  ;;  %v1995_v24 = vld [vmem:[#allocation2_spill] sm:$0xff] }
 0x1b5   :  { %v587_v36 = vmul.f32 %v1217_v51, %v571_v56  ;;  %v649_v26 = vmul.f32 %v1995_v24, %v633_v53  ;;  %v650_v38 = vmul.f32 %v1995_v24, %v634_v18  ;;  %v635_v58 = vsel %vm1300_vm4, %v614_v0, 0.0  ;;  %vm1996_vm9 = vmand %vm1577_vm7, %vm1351_vm10 }
 0x1b6   :  { %vm1997_vm0 = vcmp.lt.s32.totalorder %v1262_v63, 111  ;;  %vm1999_vm4 = vmand %vm1991_vm2, %vm1423_vm15  ;;  %v594_v49 = vadd.f32 %v586_v3, %v1724_v44  ;;  %v801_v63 = vmul.f32 0.5, %v1654_v42  ;;  %v2004_v42 = vld [vmem:[#allocation4_spill] sm:$0xff] }
 0x1b7   :  { %v660_v39 = vpop.permute.xlu1 %659  ;;  %vm2001_vm10 = vmmov %vm1997_vm0 }
 0x1b8   :  { %v673_v5 = vsel %vm1988_vm8, %v660_v39, %v1656_v54  ;;  %v675_v22 = vsel %vm1990_vm12, %v1646_v27, %v660_v39  ;;  %vm1998_vm8 = vmmov %vm1997_vm0  ;;  %v2000_v39 = vld [vmem:[#allocation3_spill] sm:$0xff] }
 0x1b9   :  { %v691_v21 = vsel %vm1991_vm2, %v673_v5, 0.0  ;;  %v706_v61 = vmul.f32 %v1247_v57, %v675_v22  ;;  %v595_v5 = vadd.f32 %v587_v36, %v1739_v7  ;;  %vm2002_vm15 = vmmov %vm1997_vm0 }
 0x1ba   :  { %v707_v23 = vmul.f32 %v1247_v57, %v691_v21 }
 0x1bb   :  { %v668_v16 = vpop.permute.xlu1 %667  ;;  %v714_v2 = vadd.f32 %v706_v61, %v649_v26  ;;  %v790_v21 = vadd.f32 %v595_v5, %v449_v9 }
 0x1bc   :  { %v677_v52 = vsel %vm1993_vm3, %v668_v16, %v1646_v27  ;;  %v671_v31 = vsel %vm1994_vm6, %v1656_v54, %v668_v16  ;;  %v636_v54 = vsel %vm1996_vm9, %v620_v35, 0.0  ;;  %v715_v34 = vadd.f32 %v707_v23, %v650_v38 }
 0x1bd   :  { %v693_v27 = vsel %vm1577_vm7, %v677_v52, 0.0  ;;  %v708_v13 = vmul.f32 %v1247_v57, %v671_v31  ;;  %v652_v14 = vmul.f32 %v1995_v24, %v636_v54  ;;  %v802_v16 = vmul.f32 0.5, %v1649_v43 }
 0x1be   :  { %v709_v37 = vmul.f32 %v1247_v57, %v693_v27  ;;  %v651_v57 = vmul.f32 %v1995_v24, %v635_v58 }
 0x1bf   :  { %v725_v12 = vpop.permute.xlu1 %724  ;;  %v818_v52 = vmul.f32 %v1764_v15, %v802_v16 }
 0x1c0   :  { %v738_v10 = vsel %vm1997_vm0, %v725_v12, %v729_v47  ;;  %v740_v51 = vsel %vm1998_vm8, %v721_v25, %v725_v12  ;;  %v716_v55 = vadd.f32 %v708_v13, %v651_v57  ;;  %v717_v8 = vadd.f32 %v709_v37, %v652_v14 }
 0x1c1   :  { %v755_v17 = vsel %vm1433_vm1, %v740_v51, 0.0  ;;  %v756_v4 = vsel %vm1999_vm4, %v738_v10, 0.0  ;;  %vm2003_vm1 = vmand %vm1577_vm7, %vm1455_vm11  ;;  %vm828_vm7 = vcmask 64512  }
 0x1c2   :  { %v771_v29 = vmul.f32 %v2000_v39, %v755_v17  ;;  %v772_v45 = vmul.f32 %v2000_v39, %v756_v4 }
 0x1c3   :  { %v733_v19 = vpop.permute.xlu1 %732 }
 0x1c4   :  { %v779_v6 = vadd.f32 %v771_v29, %v714_v2  ;;  %v780_v46 = vadd.f32 %v772_v45, %v715_v34  ;;  %v736_v32 = vsel %vm2001_vm10, %v729_v47, %v733_v19  ;;  %v742_v1 = vsel %vm2002_vm15, %v733_v19, %v721_v25 }
 0x1c5   :  { %v757_v44 = vsel %vm1406_vm13, %v736_v32, 0.0  ;;  %v758_v7 = vsel %vm2003_vm1, %v742_v1, 0.0  ;;  %v789_v25 = vadd.f32 %v594_v49, %v448_v11 }
 0x1c6   :  { %v795_v41 = vadd.f32 %v787_v62, %v779_v6  ;;  %v773_v50 = vmul.f32 %v2000_v39, %v757_v44  ;;  %v774_v48 = vmul.f32 %v2000_v39, %v758_v7  ;;  %v796_v22 = vadd.f32 %v788_v28, %v780_v46 }
 0x1c7   :  { %v817_v28 = vmul.f32 %v1788_v33, %v801_v63 }
 0x1c8   :  { %v781_v60 = vadd.f32 %v773_v50, %v716_v55  ;;  %v782_v56 = vadd.f32 %v774_v48, %v717_v8  ;;  %v820_v40 = vmul.f32 %v1729_v59, %v796_v22  ;;  %v819_v30 = vmul.f32 %v1731_v20, %v795_v41  ;;  %v826_v59 = vpop.permute.xlu0 %825 }
 0x1ca   :  { %v797_v53 = vadd.f32 %v789_v25, %v781_v60  ;;  %861 = vmatprep.subr.mxu0 %v820_v40  ;;  %v798_v18 = vadd.f32 %v790_v21, %v782_v56 }
 0x1cb   :  { %862 = vmatpush1.msra.mxu0 %v819_v30 }
 0x1cc   :  { %997 = vmatmul.mubr.msk.f32.vlgmr.msra.gmra.mxu0 %vm828_vm7, %v2004_v42  ;;  %v822_v11 = vmul.f32 %v818_v52, %v798_v18  ;;  %v821_v9 = vmul.f32 %v817_v28, %v797_v53 }
 0x1ce   :  { %932 = vmatprep.subr.mxu1 %v822_v11 }
 0x1cf   :  { %933 = vmatpush1.msra.mxu1 %v821_v9 }
 0x1d0   :  { %998 = vmatmul.mubr.msk.f32.vlgmr.msra.gmra.mxu1 %vm828_vm7, %v2004_v42 }
 0x28c   :  { %v897_v43 = vpop.f32.mrf.mxu0 }
 0x28d   :  { %v898_v3 = vadd.f32 %v897_v43, %v826_v59 }
 0x28e   :  { %v899_v20 = vpop.f32.mrf.mxu0 }
 0x28f   :  { %v900_v0 = vadd.f32 %v899_v20, %v826_v59 }
 0x290   :  { %v968_v35 = vpop.f32.mrf.mxu1 }
 0x291   :  { %v975_v61 = vcombine.low %v898_v3, %v900_v0  ;;  %v969_v15 = vadd.f32 %v968_v35, %v826_v59 }
 0x292   :  { %v970_v23 = vpop.f32.mrf.mxu1 }
 0x293   :  { %977 = vst [vmem:[%s1917_s3] sm:$0xff] %v975_v61  ;;  %v971_v33 = vadd.f32 %v970_v23, %v826_v59 }
 0x295   :  { %v980_v31 = vcombine.low %v969_v15, %v971_v33 }
 0x297   :  { %999 = vst [vmem:[%s1917_s3 + $0x8] sm:$0xff] %v980_v31 }

</bundles_post_ra>
